<compile_context>
chip_gen: v6e
topology: v6e:2x2x1
jax: 0.10.0
libtpu: 0.0.40
codegen_flags: <defaults>
</compile_context>

<pallas_src>
import functools

import jax
import jax.numpy as jnp
from jax import lax
from jax.experimental import pallas as pl
from jax.experimental.pallas import tpu as pltpu


def _scalenorm_kernel(g_ref, x_ref, o_ref, *, eps):
    # g_ref: SMEM scalar parameter (shape (1,), f32)
    # x_ref / o_ref: (tm, hidden) VMEM tiles
    x = x_ref[...]
    x32 = x.astype(jnp.float32)
    # f32 accumulation of the squared sum over the hidden (lane) axis.
    sq = jnp.sum(x32 * x32, axis=-1, keepdims=True)
    g = g_ref[0]
    # max(||x||, eps) == sqrt(max(sq, eps^2)); rsqrt uses the (otherwise idle)
    # EUP slot and removes the divide from the per-tile chain.
    scale = g * lax.rsqrt(jnp.maximum(sq, eps * eps))
    # Keep the output multiply in the native dtype; only the (tm, 1) scale is cast.
    o_ref[...] = (x * scale.astype(x.dtype)).astype(o_ref.dtype)


# Budget for the tile working set: 2x input + 2x output double buffers in the
# native dtype plus ~2x f32 temporaries. 40 MiB fits v7x's 64 MiB VMEM with
# headroom; v5e/v6e (128 MiB physical) are comfortably inside.
_VMEM_TILE_BUDGET = 40 * 1024 * 1024
_VMEM_LIMIT_BYTES = 48 * 1024 * 1024
_MAX_ROW_TILE = 2048


def scale_norm(x, g, eps=1e-6):
    """ScaleNorm forward: x * (g / max(||x||_2 over last dim, eps)).

    x: array of shape (..., hidden)
    g: scalar parameter, shape (1,)
    """
    orig_shape = x.shape
    hidden = orig_shape[-1]
    rows = 1
    for d in orig_shape[:-1]:
        rows *= int(d)
    x2 = x.reshape(rows, hidden)

    itemsize = int(jnp.dtype(x.dtype).itemsize)
    # Sublane packing: 8 rows for 32-bit, 16 for 16-bit, 32 for 8-bit dtypes.
    sublane = 8 * max(1, 4 // itemsize)

    # Per-row VMEM cost: 2 in + 2 out buffers (native dtype) + f32 temporaries.
    bytes_per_row = hidden * (4 * itemsize + 8)
    tm = max(sublane, (_VMEM_TILE_BUDGET // bytes_per_row) // sublane * sublane)
    tm = min(tm, _MAX_ROW_TILE)
    if rows <= tm:
        # Block equals the full row extent (always a legal block shape).
        tm = rows
    grid = (pl.cdiv(rows, tm),)

    kernel = functools.partial(_scalenorm_kernel, eps=float(eps))

    cost = pl.CostEstimate(
        flops=3 * rows * hidden,          # square + accumulate + scale multiply
        transcendentals=rows,             # one rsqrt per row
        bytes_accessed=2 * rows * hidden * itemsize + 4,
    )

    out = pl.pallas_call(
        kernel,
        out_shape=jax.ShapeDtypeStruct((rows, hidden), x.dtype),
        grid_spec=pl.GridSpec(
            grid=grid,
            in_specs=[
                pl.BlockSpec(memory_space=pltpu.SMEM),          # g (scalar param)
                pl.BlockSpec((tm, hidden), lambda i: (i, 0)),   # x row tile
            ],
            out_specs=pl.BlockSpec((tm, hidden), lambda i: (i, 0)),
        ),
        compiler_params=pltpu.CompilerParams(
            dimension_semantics=("parallel",),  # shards across v7x's 2 TCs
            vmem_limit_bytes=_VMEM_LIMIT_BYTES,
        ),
        cost_estimate=cost,
    )(g.astype(jnp.float32), x2)

    return out.reshape(orig_shape)


if __name__ == "__main__":
    key = jax.random.PRNGKey(0)
    batch, seq, hidden = 2, 8, 32

    # Deterministic parameter init, matching torch init: g = sqrt(hidden_size)
    g = jnp.sqrt(jnp.array([float(hidden)], dtype=jnp.float32))

    # --- f32 check ---
    x = jax.random.normal(key, (batch, seq, hidden), dtype=jnp.float32)
    out = scale_norm(x, g, eps=1e-6)
    out = jax.block_until_ready(out)

    norm_ref = jnp.maximum(
        jnp.linalg.norm(x, ord=2, axis=-1, keepdims=True), 1e-6
    )
    ref = x * (g / norm_ref)
    assert out.shape == x.shape and out.dtype == x.dtype
    assert jnp.allclose(out, ref, atol=1e-5, rtol=1e-5)

    # --- bf16 check (native-dtype output-multiply path) ---
    xb = x.astype(jnp.bfloat16)
    outb = jax.block_until_ready(scale_norm(xb, g, eps=1e-6))
    xb32 = xb.astype(jnp.float32)
    norm_b = jnp.maximum(
        jnp.linalg.norm(xb32, ord=2, axis=-1, keepdims=True), 1e-6
    )
    refb = xb32 * (g / norm_b)
    assert outb.shape == xb.shape and outb.dtype == xb.dtype
    assert jnp.allclose(outb.astype(jnp.float32), refb, atol=2e-2, rtol=2e-2)

    print("KERNEL_OK")
</pallas_src>

<mosaic_0001>
module attributes {stable_mosaic.version = 11 : i64} {
  func.func @_scalenorm_kernel(%arg0: i32, %arg1: memref<1xf32, #tpu.memory_space<smem>>, %arg2: memref<16x32xf32, #tpu.memory_space<vmem>>, %arg3: memref<16x32xf32, #tpu.memory_space<vmem>>) attributes {dimension_semantics = [#tpu.dimension_semantics<parallel>], iteration_bounds = array<i64: 1>, scalar_prefetch = 0 : i64, scratch_operands = 0 : i64, tpu.core_type = #tpu.core_type<tc>, window_params = [{transform_indices = @transform_0, window_bounds = array<i64: 1>}, {transform_indices = @transform_1, window_bounds = array<i64: 16, 32>}, {transform_indices = @transform_2, window_bounds = array<i64: 16, 32>}]} {
    %c0 = arith.constant 0 : index
    %c0_0 = arith.constant 0 : index
    %0 = vector.load %arg2[%c0, %c0_0] : memref<16x32xf32, #tpu.memory_space<vmem>>, vector<16x32xf32>
    %1 = arith.mulf %0, %0 : vector<16x32xf32>
    %cst = arith.constant dense<0.000000e+00> : vector<16xf32>
    %2 = vector.multi_reduction <add>, %1, %cst [1] : vector<16x32xf32> to vector<16xf32>
    %3 = vector.shape_cast %2 : vector<16xf32> to vector<16x1xf32>
    %c0_1 = arith.constant 0 : index
    %4 = memref.load %arg1[%c0_1] : memref<1xf32, #tpu.memory_space<smem>>
    %cst_2 = arith.constant 9.99999996E-13 : f32
    %5 = vector.broadcast %cst_2 : f32 to vector<16x1xf32>
    %6 = arith.maximumf %3, %5 : vector<16x1xf32>
    %7 = math.rsqrt %6 : vector<16x1xf32>
    %8 = vector.broadcast %4 : f32 to vector<16x1xf32>
    %9 = arith.mulf %8, %7 : vector<16x1xf32>
    %10 = vector.broadcast %9 : vector<16x1xf32> to vector<16x32xf32>
    %11 = arith.mulf %0, %10 : vector<16x32xf32>
    %c0_3 = arith.constant 0 : index
    %c0_4 = arith.constant 0 : index
    %12 = vector.load %arg3[%c0_3, %c0_4] : memref<16x32xf32, #tpu.memory_space<vmem>>, vector<16x32xf32>
    tpu.vector_store %arg3[%c0_3, %c0_4], %11 {strides = array<i32>} : memref<16x32xf32, #tpu.memory_space<vmem>>, vector<16x32xf32>,
    return
  }
  func.func @transform_0(%arg0: i32) -> i32 {
    %c0_i32 = arith.constant 0 : i32
    %c0_i32_0 = arith.constant 0 : i32
    return %c0_i32 : i32
  }
  func.func @transform_1(%arg0: i32) -> (i32, i32) {
    %c0_i32 = arith.constant 0 : i32
    %c0_i32_0 = arith.constant 0 : i32
    return %arg0, %c0_i32 : i32, i32
  }
  func.func @transform_2(%arg0: i32) -> (i32, i32) {
    %c0_i32 = arith.constant 0 : i32
    %c0_i32_0 = arith.constant 0 : i32
    return %arg0, %c0_i32 : i32, i32
  }
}

</mosaic_0001>

<bundles_post_ra>
// kernel: tpu_custom_call.1
= control target key start
LH: loop header
LB: loop body
LE: loop exit
PB: predicated region body
PF: predicated region fallthrough
CT: control target
= control target key end

     0   :  { %8 = vsyncpa [#allocation4], 0  ;;  %s157_s0 = inlined_call_operand.<no memory space> [shape: f32[1], index: 0, kind: input, shape index: {}]   ;;  %s158_s1 = inlined_call_operand.hbm [shape: f32[16,32], index: 1, kind: input, shape index: {}]   ;;  %s159_s2 = inlined_call_operand.hbm [shape: f32[16,32], index: 2, kind: output, shape index: {}]  }
   0x1   :  { %9 = vsyncpa [#allocation5], 0  ;;  %s119_s9 = smov [#allocation3]  }
   0x2   :  { %s17_s10 = sshll.u32 %s119_s9, 4  ;;  %s18_s10 = int_to_ptr.vmem [resolvable:$true] %s17_s10 }
   0x3   :  { %s83_s11 = scalar_lea.vmem %s18_s10, 256  ;;  %p88_p1 = scmp.lt.s32.totalorder %s18_s10, %s18_s10 }
   0x4   :  { %p84_p0 = scmp.ne.s32.totalorder %s18_s10, %s83_s11  ;;  %p89_p2 = scmp.lt.s32.totalorder %s83_s11, %s83_s11 }
   0x6   :  { %p90_p3 = por %p89_p2, %p88_p1 }
   0x8   :  { %p91_p4 = pnand %p90_p3, %p84_p0 }
   0xa   :  { %94 = shalt.err (!%p91_p4)
}
   0xb   :  { %s120_s12 = smov 128   ;;  %s121_s13 = smov 8  }
   0xc   :  { %23 = dma.hbm_to_vmem [thread:$0]  %s158_s1, 256, %s18_s10, [#allocation4], %s120_s12, %s120_s12, %s121_s13  }
   0xd   :  { %115 = dma.done.wait [#allocation4], 256  }
   0xe   :  { %116 = vsyncadd [#allocation4], 4294967040  ;;  %v27_v0 = vld [vmem:[#allocation3] sm:$0xff]  ;;  %vm31_vm0 = vcmask 261120   ;;  %v28_v1 = vld [vmem:[#allocation3 + $0x8] sm:$0xff]  ;;  %v43_v10 = vstv %s157_s0  ;;  %s122_s17 = smov [#allocation6]  }
   0xf   :  { %v29_v2 = vmul.f32 %v27_v0, %v27_v0  ;;  %v30_v3 = vmul.f32 %v28_v1, %v28_v1  ;;  %s55_s18 = sshll.u32 %s122_s17, 4  ;;  %s56_s18 = int_to_ptr.vmem [resolvable:$true] %s55_s18 }
  0x10   :  { %s95_s19 = scalar_lea.vmem %s56_s18, 256  ;;  %p100_p6 = scmp.lt.s32.totalorder %s56_s18, %s56_s18 }
  0x11   :  { %v32_v4 = vsel %vm31_vm0, %v29_v2, 0.0  ;;  %v35_v5 = vsel %vm31_vm0, %v30_v3, 0.0  ;;  %p96_p5 = scmp.ne.s32.totalorder %s56_s18, %s95_s19  ;;  %p101_p7 = scmp.lt.s32.totalorder %s95_s19, %s95_s19 }
  0x12   :  { %33 = vadd.xlane.f32.xlu0 %v32_v4 }
  0x13   :  { %p102_p8 = por %p101_p7, %p100_p6 }
  0x15   :  { %p103_p9 = pnand %p102_p8, %p96_p5 }
  0x16   :  { %36 = vadd.xlane.f32.xlu0 %v35_v5 }
  0x9b   :  { %v34_v6 = vpop.xlane.xlu0 %33 }
  0x9c   :  { %v39_v7 = vmax.f32 %v34_v6, 1e-12 }
  0x9e   :  { %71 = vrsqrt.f32 %v39_v7 }
  0x9f   :  { %v37_v8 = vpop.xlane.xlu0 %36 }
  0xa0   :  { %v40_v9 = vmax.f32 %v37_v8, 1e-12 }
  0xa2   :  { %73 = vrsqrt.f32 %v40_v9 }
  0xab   :  { %v72_v11 = vpop.eup %71 }
  0xac   :  { %v44_v12 = vmul.f32 %v72_v11, %v43_v10 }
  0xae   :  { %v46_v13 = vmul.f32 %v44_v12, %v27_v0 }
  0xaf   :  { %v74_v14 = vpop.eup %73 }
  0xb0   :  { %v45_v15 = vmul.f32 %v74_v14, %v43_v10  ;;  %48 = vst.msk [vmem:[#allocation6] sm:$0xff] %vm31_vm0, %v46_v13 }
  0xb2   :  { %v47_v16 = vmul.f32 %v45_v15, %v28_v1 }
  0xb4   :  { %49 = vst.msk [vmem:[#allocation6 + $0x8] sm:$0xff] %vm31_vm0, %v47_v16 }
  0xb5   :  { %106 = shalt.err (!%p103_p9)
}
  0xb6   :  { %61 = dma.vmem_to_hbm [thread:$0]  %s56_s18, 256, %s159_s2, [#allocation5], %s120_s12, %s120_s12, %s121_s13  }
  0xb7   :  { %117 = dma.done.wait [#allocation5], 256  }
  0xb8   :  { %118 = vsyncadd [#allocation5], 4294967040 }
  0xb9   :  { %65 = vsyncpa [#allocation4], 1 }
  0xba   :  { %66 = vsyncpa [#allocation5], 1 }

</bundles_post_ra>
